<compile_context>
chip_gen: v7x
topology: tpu7x:2x2x1
jax: 0.10.0
libtpu: 0.0.40
codegen_flags: <defaults>
</compile_context>

<pallas_src>
import functools

import jax
import jax.numpy as jnp
from jax.experimental import pallas as pl
from jax.experimental.pallas import tpu as pltpu


def _round_up(x: int, m: int) -> int:
    return ((x + m - 1) // m) * m


def _multicumsum_kernel(x_ref, w_ref, b_ref, o_ref):
    # x_ref: (TN, D)  w_ref: (D, C)  b_ref: (1, C)  o_ref: (TN, C)
    # Linear layer: operands in native dtype straight to the MXU, f32 accumulation.
    logits = jnp.dot(x_ref[...], w_ref[...], preferred_element_type=jnp.float32)
    logits = logits + b_ref[...].astype(jnp.float32)

    # Numerically stable softmax over the class axis (per row).
    m = jnp.max(logits, axis=-1, keepdims=True)
    e = jnp.exp(logits - m)
    denom = jnp.sum(e, axis=-1, keepdims=True)
    # Exact division (not approx reciprocal): downstream cumsum wants rows that
    # sum to 1 to full precision, and EUP has slack here anyway.
    pdf = e / denom

    o_ref[...] = pdf.astype(o_ref.dtype)


@functools.partial(jax.jit, static_argnames=("tile_n",))
def multi_cumsum_layer(encoding, weight, bias, *, tile_n: int = 4096):
    """encoding: (N, D), weight: (D, C), bias: (C,) -> pdf (N, C)."""
    N, D = encoding.shape
    D_w, C = weight.shape
    assert D_w == D
    assert bias.shape == (C,)

    b2 = bias.reshape(1, C)

    # Row tile: multiple of the sublane packing (8 for f32, 16 for bf16).
    sub = 16 if encoding.dtype == jnp.bfloat16 else 8
    # Large tile to amortize per-step overhead, but cap at ~N/2 so the batch
    # grid exposes >= 2 tiles when N allows (v7x megacore sharding).
    tn = max(sub, min(_round_up(tile_n, sub), _round_up(pl.cdiv(N, 2), sub)))
    grid = (pl.cdiv(N, tn),)  # ragged last block is clipped by Pallas

    x_b = encoding.dtype.itemsize
    w_b = weight.dtype.itemsize
    b_b = bias.dtype.itemsize

    # Double-buffered x/out tiles + resident weight/bias + slack.
    vmem_bytes = (2 * tn * D * x_b + 2 * tn * C * x_b
                  + 2 * D * C * w_b + 2 * C * b_b + (1 << 20))
    vmem_bytes = min(max(vmem_bytes, 4 << 20), 64 << 20)

    cost = pl.CostEstimate(
        flops=2 * N * D * C,
        transcendentals=N * C,
        bytes_accessed=N * D * x_b + D * C * w_b + C * b_b + N * C * x_b,
    )

    out = pl.pallas_call(
        _multicumsum_kernel,
        out_shape=jax.ShapeDtypeStruct((N, C), encoding.dtype),
        grid_spec=pl.GridSpec(
            grid=grid,
            in_specs=[
                pl.BlockSpec((tn, D), lambda i: (i, 0)),   # x tile, pipelined
                pl.BlockSpec((D, C), lambda i: (0, 0)),    # weight, resident
                pl.BlockSpec((1, C), lambda i: (0, 0)),    # bias, resident
            ],
            out_specs=pl.BlockSpec((tn, C), lambda i: (i, 0)),
        ),
        compiler_params=pltpu.CompilerParams(
            dimension_semantics=("parallel",),  # independent row tiles
            vmem_limit_bytes=vmem_bytes,
        ),
        cost_estimate=cost,
    )(encoding, weight, b2)

    return out


def _reference(encoding, weight, bias):
    return jax.nn.softmax(encoding @ weight + bias, axis=1)


if __name__ == "__main__":
    # Shapes consistent with the module:
    # dim_encoding=32, num_bin=7 -> C = num_bin + 1 = 8, batch N=8
    dim_encoding, num_bin = 32, 7
    C = num_bin + 1

    key = jax.random.PRNGKey(0)
    k_x, k_w, k_b, k_x2 = jax.random.split(key, 4)

    # Deterministic parameter init (mimics nn.Linear's uniform(-1/sqrt(D), 1/sqrt(D))).
    # Weight stored as (D, C) = transpose of PyTorch's (C, D); math is identical.
    bound = 1.0 / jnp.sqrt(jnp.float32(dim_encoding))
    weight = jax.random.uniform(k_w, (dim_encoding, C), jnp.float32, -bound, bound)
    bias = jax.random.uniform(k_b, (C,), jnp.float32, -bound, bound)

    # Test 1: tiny batch (single grid step).
    N1 = 8
    enc1 = jax.random.normal(k_x, (N1, dim_encoding), jnp.float32)
    pdf1 = jax.block_until_ready(multi_cumsum_layer(enc1, weight, bias))
    ref1 = _reference(enc1, weight, bias)
    assert pdf1.shape == (N1, C)
    assert jnp.allclose(pdf1, ref1, atol=1e-5, rtol=1e-4)
    assert jnp.allclose(jnp.sum(pdf1, axis=1), 1.0, atol=1e-5)

    # Test 2: ragged batch exercising a multi-tile grid and the clipped last block.
    N2 = 300
    enc2 = jax.random.normal(k_x2, (N2, dim_encoding), jnp.float32)
    pdf2 = jax.block_until_ready(multi_cumsum_layer(enc2, weight, bias))
    ref2 = _reference(enc2, weight, bias)
    assert pdf2.shape == (N2, C)
    assert jnp.allclose(pdf2, ref2, atol=1e-5, rtol=1e-4)
    assert jnp.allclose(jnp.sum(pdf2, axis=1), 1.0, atol=1e-5)

    print("KERNEL_OK")
</pallas_src>

<mosaic_0001>
module attributes {stable_mosaic.version = 11 : i64} {
  func.func @_multicumsum_kernel(%arg0: i32, %arg1: memref<8x32xf32, #tpu.memory_space<vmem>>, %arg2: memref<32x8xf32, #tpu.memory_space<vmem>>, %arg3: memref<1x8xf32, #tpu.memory_space<vmem>>, %arg4: memref<8x8xf32, #tpu.memory_space<vmem>>) attributes {dimension_semantics = [#tpu.dimension_semantics<parallel>], iteration_bounds = array<i64: 1>, scalar_prefetch = 0 : i64, scratch_operands = 0 : i64, tpu.core_type = #tpu.core_type<tc>, window_params = [{transform_indices = @transform_0, window_bounds = array<i64: 8, 32>}, {pipeline_mode = #tpu.pipeline_mode<synchronous>, transform_indices = @transform_1, window_bounds = array<i64: 32, 8>}, {pipeline_mode = #tpu.pipeline_mode<synchronous>, transform_indices = @transform_2, window_bounds = array<i64: 1, 8>}, {transform_indices = @transform_3, window_bounds = array<i64: 8, 8>}]} {
    %c0 = arith.constant 0 : index
    %c0_0 = arith.constant 0 : index
    %0 = vector.load %arg1[%c0, %c0_0] : memref<8x32xf32, #tpu.memory_space<vmem>>, vector<8x32xf32>
    %c0_1 = arith.constant 0 : index
    %c0_2 = arith.constant 0 : index
    %1 = vector.load %arg2[%c0_1, %c0_2] : memref<32x8xf32, #tpu.memory_space<vmem>>, vector<32x8xf32>
    %cst = arith.constant dense<0.000000e+00> : vector<8x8xf32>
    %2 = tpu.matmul %0, %1, %cst {dimension_numbers = #tpu.dot_dimension_numbers<[1], [0], [0], [1], [0, 0, 1, 1], [], []>} : vector<8x32xf32>, vector<32x8xf32>, vector<8x8xf32> -> vector<8x8xf32>
    %c0_3 = arith.constant 0 : index
    %c0_4 = arith.constant 0 : index
    %3 = vector.load %arg3[%c0_3, %c0_4] : memref<1x8xf32, #tpu.memory_space<vmem>>, vector<1x8xf32>
    %4 = vector.broadcast %3 : vector<1x8xf32> to vector<8x8xf32>
    %5 = arith.addf %2, %4 : vector<8x8xf32>
    %cst_5 = arith.constant dense<0xFF800000> : vector<8xf32>
    %6 = vector.multi_reduction <maximumf>, %5, %cst_5 [1] : vector<8x8xf32> to vector<8xf32>
    %7 = vector.shape_cast %6 : vector<8xf32> to vector<8x1xf32>
    %8 = vector.broadcast %7 : vector<8x1xf32> to vector<8x8xf32>
    %9 = arith.subf %5, %8 : vector<8x8xf32>
    %10 = math.exp %9 : vector<8x8xf32>
    %cst_6 = arith.constant dense<0.000000e+00> : vector<8xf32>
    %11 = vector.multi_reduction <add>, %10, %cst_6 [1] : vector<8x8xf32> to vector<8xf32>
    %12 = vector.shape_cast %11 : vector<8xf32> to vector<8x1xf32>
    %13 = vector.broadcast %12 : vector<8x1xf32> to vector<8x8xf32>
    %14 = arith.divf %10, %13 : vector<8x8xf32>
    %c0_7 = arith.constant 0 : index
    %c0_8 = arith.constant 0 : index
    %15 = vector.load %arg4[%c0_7, %c0_8] : memref<8x8xf32, #tpu.memory_space<vmem>>, vector<8x8xf32>
    tpu.vector_store %arg4[%c0_7, %c0_8], %14 {strides = array<i32>} : memref<8x8xf32, #tpu.memory_space<vmem>>, vector<8x8xf32>,
    return
  }
  func.func @transform_0(%arg0: i32) -> (i32, i32) {
    %c0_i32 = arith.constant 0 : i32
    %c0_i32_0 = arith.constant 0 : i32
    return %arg0, %c0_i32 : i32, i32
  }
  func.func @transform_1(%arg0: i32) -> (i32, i32) {
    %c0_i32 = arith.constant 0 : i32
    %c0_i32_0 = arith.constant 0 : i32
    %c0_i32_1 = arith.constant 0 : i32
    return %c0_i32, %c0_i32_0 : i32, i32
  }
  func.func @transform_2(%arg0: i32) -> (i32, i32) {
    %c0_i32 = arith.constant 0 : i32
    %c0_i32_0 = arith.constant 0 : i32
    %c0_i32_1 = arith.constant 0 : i32
    return %c0_i32, %c0_i32_0 : i32, i32
  }
  func.func @transform_3(%arg0: i32) -> (i32, i32) {
    %c0_i32 = arith.constant 0 : i32
    %c0_i32_0 = arith.constant 0 : i32
    return %arg0, %c0_i32 : i32, i32
  }
}

</mosaic_0001>

<bundles_post_ra>
// kernel: multi_cumsum_layer.1
= control target key start
LH: loop header
LB: loop body
LE: loop exit
PB: predicated region body
PF: predicated region fallthrough
CT: control target
= control target key end

     0   :  { %v184_v3 = vmov 0.0|0.0   ;;  %vm185_vm0 = vmmov 0   ;;  %v186_v6 = vmov 0.0   ;;  %s241_s0 = inlined_call_operand.vmem [shape: f32[8,32], index: 0, kind: input, shape index: {}]   ;;  %s242_s1 = inlined_call_operand.vmem [shape: f32[32,8], index: 1, kind: input, shape index: {}]   ;;  %s243_s2 = inlined_call_operand.vmem [shape: f32[1,8], index: 2, kind: input, shape index: {}]   ;;  %s244_s3 = inlined_call_operand.hbm [shape: f32[8,8], index: 3, kind: output, shape index: {}]  }
   0x1   :  { %v16_v0 = vld [vmem:[%s242_s1] sm:$0xff]  ;;  %v17_v1 = vld [vmem:[%s242_s1 + $0x8] sm:$0xff]  ;;  %v18_v2 = vld [vmem:[%s242_s1 + $0x10] sm:$0xff]  ;;  %146 = vmatprep.subr.bf16.mxu0 %v184_v3  ;;  %143 = vmatprep.mubr.msk.f32.mxu0 %vm185_vm0, %v186_v6 }
   0x2   :  { %v147_v4 = vpack.c.bf16 %v17_v1, %v16_v0  ;;  %v19_v5 = vld [vmem:[%s242_s1 + $0x18] sm:$0xff] }
   0x3   :  { %8 = vsyncpa [#allocation3], 0  ;;  %v150_v7 = vpack.c.bf16 %v19_v5, %v18_v2  ;;  %v15_v8 = vld [vmem:[%s241_s0] sm:$0xff]  ;;  %vm27_vm1 = vcmask 261120   ;;  %vm101_vm2 = vcmask 64512   ;;  %s187_s0 = smov [#allocation2]  }
   0x4   :  { %148 = vmatpush3.bf16.msra.mxu0 %v147_v4  ;;  %v128_v9 = vld [vmem:[%s243_s2] ss:$0 sm:$0xff]  ;;  %s120_s1 = sshll.u32 %s187_s0, 4  ;;  %s121_s1 = int_to_ptr.vmem [resolvable:$true] %s120_s1 }
   0x5   :  { %149 = vmatprep.subr.bf16.mxu0 %v184_v3  ;;  %s160_s2 = scalar_lea.vmem %s121_s1, 128  ;;  %p165_p1 = scmp.lt.s32.totalorder %s121_s1, %s121_s1 }
   0x6   :  { %p161_p0 = scmp.ne.s32.totalorder %s121_s1, %s160_s2  ;;  %p166_p2 = scmp.lt.s32.totalorder %s160_s2, %s160_s2 }
   0x8   :  { %151 = vmatpush3.bf16.msra.mxu0 %v150_v7  ;;  %p167_p3 = por %p166_p2, %p165_p1 }
   0xa   :  { %p168_p4 = pnand %p167_p3, %p161_p0 }
   0xb   :  { %144 = vmatmul.mubr.msk.f32.vlgmr.msra.gmra.mrb[0].mxu0 %vm27_vm1, %v15_v8 }
  0xde   :  { %v97_v10 = vpop.f32.mrb[0].mxu0 }
  0xdf   :  { %v98_v11 = vadd.f32 %v128_v9, %v97_v10  ;;  %v145_v12 = vpop.f32.mrb[1].mxu0 }
  0xe1   :  { %v102_v13 = vsel %vm101_vm2, %v98_v11, -inf }
  0xe2   :  { %103 = vmax.xlane.f32.xlu0 %v102_v13 }
 0x16f   :  { %v104_v14 = vpop.xlane.xlu0 %103 }
 0x170   :  { %v105_v15 = vsub.f32 %v98_v11, %v104_v14 }
 0x172   :  { %v106_v16 = vmul.f32 1.442695, %v105_v15 }
 0x174   :  { %156 = vpow2.f32 %v106_v16 }
 0x17e   :  { %v157_v17 = vpop.eup %156 }
 0x17f   :  { %v108_v18 = vsel %vm101_vm2, %v157_v17, 0.0 }
 0x180   :  { %109 = vadd.xlane.f32.xlu0 %v108_v18 }
 0x20d   :  { %v110_v19 = vpop.xlane.xlu0 %109 }
 0x20e   :  { %158 = vrcp.f32 %v110_v19 }
 0x218   :  { %v159_v20 = vpop.eup %158 }
 0x219   :  { %v112_v21 = vmul.f32 %v159_v20, %v157_v17 }
 0x21b   :  { %113 = vst.msk [vmem:[#allocation2] sm:$0xff] %vm101_vm2, %v112_v21 }
 0x21c   :  { %171 = shalt.err (!%p168_p4)
}
 0x21d   :  { %s172_s26 = scalar_lea.hbm %s244_s3, 128 }
 0x21e   :  { %p173_p5 = scmp.ne.s32.totalorder %s244_s3, %s172_s26  ;;  %p176_p6 = scmp.lt.u32.totalorder %s172_s26, %s244_s3 }
 0x220   :  { %p178_p7 = pnand %p176_p6, %p173_p5 }
 0x222   :  { %181 = shalt.err (!%p178_p7)
}
 0x223   :  { %123 = dma.vmem_to_hbm [thread:$0]  %s121_s1, 128, %s244_s3, [#allocation3]  }
 0x224   :  { %182 = dma.done.wait [#allocation3], 128  }
 0x225   :  { %183 = vsyncadd [#allocation3], 4294967168 }
 0x226   :  { %127 = vsyncpa [#allocation3], 1 }

</bundles_post_ra>
